<compile_context>
chip_gen: v7x
topology: tpu7x:2x2x1
jax: 0.10.0
libtpu: 0.0.40
codegen_flags: <defaults>
</compile_context>

<pallas_src>
import jax
import jax.numpy as jnp
import numpy as np
from jax.experimental import pallas as pl
from jax.experimental.pallas import tpu as pltpu


def _copy_kernel(x_ref, o_ref):
    # Whole-tile VMEM -> VMEM copy; the BlockSpec pipeline handles HBM DMAs.
    o_ref[...] = x_ref[...]


def _choose_row_tile(rows, cols, itemsize, target_bytes=2 * 1024 * 1024):
    """Largest row tile (multiple of 8) whose block is ~target_bytes."""
    if rows * cols * itemsize <= target_bytes:
        return rows
    rt = (target_bytes // max(1, cols * itemsize)) // 8 * 8
    rt = max(8, rt)
    return min(rows, rt)


def _identity_one(x):
    """Pass one array through a tiled Pallas copy kernel."""
    x = jnp.asarray(x)
    orig_shape = x.shape

    # Flatten to 2D with the original last dim as the lane (fast) axis.
    if x.ndim == 0:
        x2d = x.reshape(1, 1)
    elif x.ndim == 1:
        x2d = x.reshape(1, x.shape[0])
    else:
        x2d = x.reshape(-1, x.shape[-1])
    rows, cols = x2d.shape

    bt = _choose_row_tile(rows, cols, x2d.dtype.itemsize)
    grid = (pl.cdiv(rows, bt),)

    out2d = pl.pallas_call(
        _copy_kernel,
        out_shape=jax.ShapeDtypeStruct((rows, cols), x2d.dtype),
        grid_spec=pltpu.PrefetchScalarGridSpec(
            num_scalar_prefetch=0,
            grid=grid,
            in_specs=[pl.BlockSpec((bt, cols), lambda i: (i, 0))],
            out_specs=pl.BlockSpec((bt, cols), lambda i: (i, 0)),
        ),
        compiler_params=pltpu.CompilerParams(
            dimension_semantics=("parallel",),
        ),
    )(x2d)

    return out2d.reshape(orig_shape)


def identity(*inputs):
    """Pallas equivalent of Identity.forward(*input) -> returns input tuple."""
    return tuple(_identity_one(a) for a in inputs)


if __name__ == "__main__":
    key = jax.random.PRNGKey(0)
    k1, k2, k3 = jax.random.split(key, 3)

    # Small deterministic inputs; Identity takes *input, so test several.
    x = jax.random.normal(k1, (2, 4, 16, 16), jnp.float32)
    s = jax.random.normal(k2, (8, 32), jnp.float32)
    idx = jax.random.randint(k3, (2, 8), 0, 100, jnp.int32)

    outs = identity(x, s, idx)
    outs = jax.block_until_ready(outs)

    assert isinstance(outs, tuple) and len(outs) == 3
    for inp, out in zip((x, s, idx), outs):
        assert out.shape == inp.shape and out.dtype == inp.dtype
        # Identity must be bit-exact.
        assert np.array_equal(np.asarray(out), np.asarray(inp)), "identity mismatch"

    print("KERNEL_OK")
</pallas_src>

<mosaic_0001>
module attributes {stable_mosaic.version = 11 : i64} {
  func.func @_copy_kernel(%arg0: i32, %arg1: memref<128x16xf32, #tpu.memory_space<vmem>>, %arg2: memref<128x16xf32, #tpu.memory_space<vmem>>) attributes {dimension_semantics = [#tpu.dimension_semantics<parallel>], iteration_bounds = array<i64: 1>, scalar_prefetch = 0 : i64, scratch_operands = 0 : i64, tpu.core_type = #tpu.core_type<tc>, window_params = [{transform_indices = @transform_0, window_bounds = array<i64: 128, 16>}, {transform_indices = @transform_1, window_bounds = array<i64: 128, 16>}]} {
    %c0 = arith.constant 0 : index
    %c0_0 = arith.constant 0 : index
    %0 = vector.load %arg1[%c0, %c0_0] : memref<128x16xf32, #tpu.memory_space<vmem>>, vector<128x16xf32>
    %c0_1 = arith.constant 0 : index
    %c0_2 = arith.constant 0 : index
    %1 = vector.load %arg2[%c0_1, %c0_2] : memref<128x16xf32, #tpu.memory_space<vmem>>, vector<128x16xf32>
    tpu.vector_store %arg2[%c0_1, %c0_2], %0 {strides = array<i32>} : memref<128x16xf32, #tpu.memory_space<vmem>>, vector<128x16xf32>,
    return
  }
  func.func @transform_0(%arg0: i32) -> (i32, i32) {
    %c0_i32 = arith.constant 0 : i32
    %c0_i32_0 = arith.constant 0 : i32
    return %arg0, %c0_i32 : i32, i32
  }
  func.func @transform_1(%arg0: i32) -> (i32, i32) {
    %c0_i32 = arith.constant 0 : i32
    %c0_i32_0 = arith.constant 0 : i32
    return %arg0, %c0_i32 : i32, i32
  }
}

</mosaic_0001>

<bundles_post_ra>
// kernel: tpu_custom_call.1
= control target key start
LH: loop header
LB: loop body
LE: loop exit
PB: predicated region body
PF: predicated region fallthrough
CT: control target
= control target key end

     0   :  { %vm24_vm0 = vcmask 130048   ;;  %s167_s0 = inlined_call_operand.vmem [shape: f32[128,16], index: 0, kind: input, shape index: {}]   ;;  %s168_s1 = inlined_call_operand.vmem [shape: f32[128,16], index: 1, kind: output, shape index: {}]  }
   0x1   :  { %v8_v0 = vld [vmem:[%s167_s0] sm:$0xff]  ;;  %v9_v1 = vld [vmem:[%s167_s0 + $0x8] sm:$0xff]  ;;  %v10_v2 = vld [vmem:[%s167_s0 + $0x10] sm:$0xff] }
   0x2   :  { %25 = vst.msk [vmem:[%s168_s1] sm:$0xff] %vm24_vm0, %v8_v0  ;;  %26 = vst.msk [vmem:[%s168_s1 + $0x8] sm:$0xff] %vm24_vm0, %v9_v1  ;;  %v11_v3 = vld [vmem:[%s167_s0 + $0x18] sm:$0xff]  ;;  %v12_v4 = vld [vmem:[%s167_s0 + $0x20] sm:$0xff] }
   0x3   :  { %27 = vst.msk [vmem:[%s168_s1 + $0x10] sm:$0xff] %vm24_vm0, %v10_v2  ;;  %v13_v5 = vld [vmem:[%s167_s0 + $0x28] sm:$0xff]  ;;  %28 = vst.msk [vmem:[%s168_s1 + $0x18] sm:$0xff] %vm24_vm0, %v11_v3  ;;  %v14_v6 = vld [vmem:[%s167_s0 + $0x30] sm:$0xff] }
   0x4   :  { %29 = vst.msk [vmem:[%s168_s1 + $0x20] sm:$0xff] %vm24_vm0, %v12_v4  ;;  %30 = vst.msk [vmem:[%s168_s1 + $0x28] sm:$0xff] %vm24_vm0, %v13_v5  ;;  %v15_v7 = vld [vmem:[%s167_s0 + $0x38] sm:$0xff]  ;;  %v16_v8 = vld [vmem:[%s167_s0 + $0x40] sm:$0xff] }
   0x5   :  { %31 = vst.msk [vmem:[%s168_s1 + $0x30] sm:$0xff] %vm24_vm0, %v14_v6  ;;  %32 = vst.msk [vmem:[%s168_s1 + $0x38] sm:$0xff] %vm24_vm0, %v15_v7  ;;  %v17_v9 = vld [vmem:[%s167_s0 + $0x48] sm:$0xff]  ;;  %v18_v10 = vld [vmem:[%s167_s0 + $0x50] sm:$0xff] }
   0x6   :  { %33 = vst.msk [vmem:[%s168_s1 + $0x40] sm:$0xff] %vm24_vm0, %v16_v8  ;;  %v19_v11 = vld [vmem:[%s167_s0 + $0x58] sm:$0xff]  ;;  %34 = vst.msk [vmem:[%s168_s1 + $0x48] sm:$0xff] %vm24_vm0, %v17_v9  ;;  %v20_v12 = vld [vmem:[%s167_s0 + $0x60] sm:$0xff] }
   0x7   :  { %35 = vst.msk [vmem:[%s168_s1 + $0x50] sm:$0xff] %vm24_vm0, %v18_v10  ;;  %36 = vst.msk [vmem:[%s168_s1 + $0x58] sm:$0xff] %vm24_vm0, %v19_v11  ;;  %v21_v13 = vld [vmem:[%s167_s0 + $0x68] sm:$0xff]  ;;  %v22_v14 = vld [vmem:[%s167_s0 + $0x70] sm:$0xff] }
   0x8   :  { %37 = vst.msk [vmem:[%s168_s1 + $0x60] sm:$0xff] %vm24_vm0, %v20_v12  ;;  %38 = vst.msk [vmem:[%s168_s1 + $0x68] sm:$0xff] %vm24_vm0, %v21_v13  ;;  %v23_v15 = vld [vmem:[%s167_s0 + $0x78] sm:$0xff] }
   0x9   :  { %39 = vst.msk [vmem:[%s168_s1 + $0x70] sm:$0xff] %vm24_vm0, %v22_v14  ;;  %40 = vst.msk [vmem:[%s168_s1 + $0x78] sm:$0xff] %vm24_vm0, %v23_v15 }

</bundles_post_ra>
